<compile_context>
chip_gen: v7x
topology: tpu7x:2x2x1
jax: 0.10.0
libtpu: 0.0.40
codegen_flags: <defaults>
</compile_context>

<pallas_src>
import math

import jax
import jax.numpy as jnp
from jax.experimental import pallas as pl
from jax.experimental.pallas import tpu as pltpu

N_HIDDEN = 8
IN_DIM = 2
HID_DIM = 10
OUT_DIM = 2


def _round_up(x, m):
    return (x + m - 1) // m * m


def _mlp_kernel(x_ref, wh_ref, bh_ref, wp_ref, bp_ref, out_ref):
    """All operands in the batch-on-lanes layout.

    x_ref  : (HID_DIM, TB)        padded input features (rows >= IN_DIM are zero)
    wh_ref : (N_HIDDEN, HID_DIM, HID_DIM)   hidden weights, (out, in); layer 0 zero-padded
    bh_ref : (N_HIDDEN, HID_DIM, 1)         hidden biases
    wp_ref : (OUT_DIM, HID_DIM)             predict weights
    bp_ref : (OUT_DIM, 1)                   predict bias
    out_ref: (OUT_DIM, TB)
    """
    h = x_ref[...]  # (10, TB) f32
    # 8 hidden layers: tanh(W @ h + b); fully unrolled so LLO can schedule.
    for i in range(N_HIDDEN):
        w = wh_ref[i]      # (10, 10)
        b = bh_ref[i]      # (10, 1) -> broadcasts across the batch lanes
        h = jnp.tanh(jnp.dot(w, h, preferred_element_type=jnp.float32) + b)
    # final prediction layer (no activation)
    out_ref[...] = (
        jnp.dot(wp_ref[...], h, preferred_element_type=jnp.float32) + bp_ref[...]
    )


def net_forward(x, params, *, tb=512):
    """x: (B, 2) f32; params = (wh, bh, wp, bp) in the stacked layout from init_params.

    Returns (B, 2) f32, identical to the PyTorch forward pass.
    """
    wh, bh, wp, bp = params
    B = x.shape[0]

    # Batch tile: a multiple of 128 lanes; don't over-allocate for tiny batches.
    tb = max(128, min(tb, _round_up(B, 128)))
    b_pad = _round_up(B, tb)
    grid = (b_pad // tb,)

    # Transpose to (feature, batch); pad features 2->10 and batch B->b_pad with zeros.
    x_t = jnp.zeros((HID_DIM, b_pad), dtype=jnp.float32)
    x_t = x_t.at[:IN_DIM, :B].set(x.astype(jnp.float32).T)

    n_param_f32 = wh.size + bh.size + wp.size + bp.size
    cost = pl.CostEstimate(
        flops=2 * b_pad * (N_HIDDEN * HID_DIM * HID_DIM + HID_DIM * OUT_DIM),
        transcendentals=b_pad * N_HIDDEN * HID_DIM,
        bytes_accessed=4 * (HID_DIM * b_pad + OUT_DIM * b_pad + n_param_f32),
    )

    out_t = pl.pallas_call(
        _mlp_kernel,
        out_shape=jax.ShapeDtypeStruct((OUT_DIM, b_pad), jnp.float32),
        grid=grid,
        in_specs=[
            # activations: tile the batch (lane) axis
            pl.BlockSpec((HID_DIM, tb), lambda i: (0, i)),
            # parameters: constant block index -> VMEM-resident across steps
            pl.BlockSpec((N_HIDDEN, HID_DIM, HID_DIM), lambda i: (0, 0, 0)),
            pl.BlockSpec((N_HIDDEN, HID_DIM, 1), lambda i: (0, 0, 0)),
            pl.BlockSpec((OUT_DIM, HID_DIM), lambda i: (0, 0)),
            pl.BlockSpec((OUT_DIM, 1), lambda i: (0, 0)),
        ],
        out_specs=pl.BlockSpec((OUT_DIM, tb), lambda i: (0, i)),
        compiler_params=pltpu.CompilerParams(
            dimension_semantics=("parallel",),
        ),
        cost_estimate=cost,
    )(x_t, wh, bh, wp, bp)

    # Back to (B, 2), dropping batch padding.
    return out_t[:, :B].T


def init_params(key):
    """Deterministic parameter init in the stacked, batch-on-lanes layout.

    Weights ~ Normal(0, 1) (matching `init.normal(layer.weight, mean=0, std=1)`).
    Biases use PyTorch Linear's default U(-1/sqrt(fan_in), 1/sqrt(fan_in)).
    Weights stored as (out, in); layer 0 zero-padded from (10,2) to (10,10) so all
    hidden layers stack into one (8,10,10) array. Biases stored as (out, 1).
    """
    wh_list, bh_list = [], []
    for i in range(N_HIDDEN):
        fan_in = IN_DIM if i == 0 else HID_DIM
        key, kw, kb = jax.random.split(key, 3)
        w = jax.random.normal(kw, (HID_DIM, fan_in), dtype=jnp.float32)  # std=1
        bound = 1.0 / math.sqrt(fan_in)
        b = jax.random.uniform(kb, (HID_DIM, 1), dtype=jnp.float32,
                               minval=-bound, maxval=bound)
        if fan_in < HID_DIM:  # zero-pad unused input columns of layer 0
            w = jnp.pad(w, ((0, 0), (0, HID_DIM - fan_in)))
        wh_list.append(w)
        bh_list.append(b)

    key, kw, kb = jax.random.split(key, 3)
    wp = jax.random.normal(kw, (OUT_DIM, HID_DIM), dtype=jnp.float32)
    bound = 1.0 / math.sqrt(HID_DIM)
    bp = jax.random.uniform(kb, (OUT_DIM, 1), dtype=jnp.float32,
                            minval=-bound, maxval=bound)

    return jnp.stack(wh_list), jnp.stack(bh_list), wp, bp


def reference_forward(x, params):
    """Pure-JAX reference for correctness checking (standard (batch, feature) math)."""
    wh, bh, wp, bp = params
    # Pad the input features with zeros to match the zero-padded layer-0 weight.
    h = jnp.pad(x.astype(jnp.float32), ((0, 0), (0, HID_DIM - IN_DIM)))
    for i in range(N_HIDDEN):
        h = jnp.tanh(h @ wh[i].T + bh[i][:, 0])
    return h @ wp.T + bp[:, 0]


if __name__ == "__main__":
    key = jax.random.PRNGKey(0)
    key, kx = jax.random.split(key)
    B = 8
    x = jax.random.normal(kx, (B, IN_DIM), dtype=jnp.float32)
    params = init_params(key)

    out = net_forward(x, params)
    out = jax.block_until_ready(out)

    ref = reference_forward(x, params)
    assert out.shape == (B, OUT_DIM), out.shape
    assert jnp.allclose(out, ref, atol=1e-5, rtol=1e-5), (out, ref)

    print("KERNEL_OK")
</pallas_src>

<mosaic_0001>
module attributes {stable_mosaic.version = 11 : i64} {
  func.func @_mlp_kernel(%arg0: i32, %arg1: memref<10x128xf32, #tpu.memory_space<vmem>>, %arg2: memref<8x10x10xf32, #tpu.memory_space<vmem>>, %arg3: memref<8x10x1xf32, #tpu.memory_space<vmem>>, %arg4: memref<2x10xf32, #tpu.memory_space<vmem>>, %arg5: memref<2x1xf32, #tpu.memory_space<vmem>>, %arg6: memref<2x128xf32, #tpu.memory_space<vmem>>) attributes {dimension_semantics = [#tpu.dimension_semantics<parallel>], iteration_bounds = array<i64: 1>, scalar_prefetch = 0 : i64, scratch_operands = 0 : i64, tpu.core_type = #tpu.core_type<tc>, window_params = [{transform_indices = @transform_0, window_bounds = array<i64: 10, 128>}, {pipeline_mode = #tpu.pipeline_mode<synchronous>, transform_indices = @transform_1, window_bounds = array<i64: 8, 10, 10>}, {pipeline_mode = #tpu.pipeline_mode<synchronous>, transform_indices = @transform_2, window_bounds = array<i64: 8, 10, 1>}, {pipeline_mode = #tpu.pipeline_mode<synchronous>, transform_indices = @transform_3, window_bounds = array<i64: 2, 10>}, {pipeline_mode = #tpu.pipeline_mode<synchronous>, transform_indices = @transform_4, window_bounds = array<i64: 2, 1>}, {transform_indices = @transform_5, window_bounds = array<i64: 2, 128>}]} {
    %c0 = arith.constant 0 : index
    %c0_0 = arith.constant 0 : index
    %0 = vector.load %arg1[%c0, %c0_0] : memref<10x128xf32, #tpu.memory_space<vmem>>, vector<10x128xf32>
    %c0_1 = arith.constant 0 : index
    %c0_2 = arith.constant 0 : index
    %c0_3 = arith.constant 0 : index
    %1 = vector.load %arg2[%c0_1, %c0_2, %c0_3] : memref<8x10x10xf32, #tpu.memory_space<vmem>>, vector<1x10x10xf32>
    %2 = vector.shape_cast %1 : vector<1x10x10xf32> to vector<10x10xf32>
    %c0_4 = arith.constant 0 : index
    %c0_5 = arith.constant 0 : index
    %c0_6 = arith.constant 0 : index
    %3 = vector.load %arg3[%c0_4, %c0_5, %c0_6] : memref<8x10x1xf32, #tpu.memory_space<vmem>>, vector<1x10x1xf32>
    %4 = vector.shape_cast %3 : vector<1x10x1xf32> to vector<10x1xf32>
    %cst = arith.constant dense<0.000000e+00> : vector<10x128xf32>
    %5 = tpu.matmul %2, %0, %cst {dimension_numbers = #tpu.dot_dimension_numbers<[1], [0], [0], [1], [0, 0, 1, 1], [], []>} : vector<10x10xf32>, vector<10x128xf32>, vector<10x128xf32> -> vector<10x128xf32>
    %6 = vector.broadcast %4 : vector<10x1xf32> to vector<10x128xf32>
    %7 = arith.addf %5, %6 : vector<10x128xf32>
    %8 = math.tanh %7 : vector<10x128xf32>
    %c1 = arith.constant 1 : index
    %c0_7 = arith.constant 0 : index
    %c0_8 = arith.constant 0 : index
    %9 = vector.load %arg2[%c1, %c0_7, %c0_8] : memref<8x10x10xf32, #tpu.memory_space<vmem>>, vector<1x10x10xf32>
    %10 = vector.shape_cast %9 : vector<1x10x10xf32> to vector<10x10xf32>
    %c1_9 = arith.constant 1 : index
    %c0_10 = arith.constant 0 : index
    %c0_11 = arith.constant 0 : index
    %11 = vector.load %arg3[%c1_9, %c0_10, %c0_11] : memref<8x10x1xf32, #tpu.memory_space<vmem>>, vector<1x10x1xf32>
    %12 = vector.shape_cast %11 : vector<1x10x1xf32> to vector<10x1xf32>
    %cst_12 = arith.constant dense<0.000000e+00> : vector<10x128xf32>
    %13 = tpu.matmul %10, %8, %cst_12 {dimension_numbers = #tpu.dot_dimension_numbers<[1], [0], [0], [1], [0, 0, 1, 1], [], []>} : vector<10x10xf32>, vector<10x128xf32>, vector<10x128xf32> -> vector<10x128xf32>
    %14 = vector.broadcast %12 : vector<10x1xf32> to vector<10x128xf32>
    %15 = arith.addf %13, %14 : vector<10x128xf32>
    %16 = math.tanh %15 : vector<10x128xf32>
    %c2 = arith.constant 2 : index
    %c0_13 = arith.constant 0 : index
    %c0_14 = arith.constant 0 : index
    %17 = vector.load %arg2[%c2, %c0_13, %c0_14] : memref<8x10x10xf32, #tpu.memory_space<vmem>>, vector<1x10x10xf32>
    %18 = vector.shape_cast %17 : vector<1x10x10xf32> to vector<10x10xf32>
    %c2_15 = arith.constant 2 : index
    %c0_16 = arith.constant 0 : index
    %c0_17 = arith.constant 0 : index
    %19 = vector.load %arg3[%c2_15, %c0_16, %c0_17] : memref<8x10x1xf32, #tpu.memory_space<vmem>>, vector<1x10x1xf32>
    %20 = vector.shape_cast %19 : vector<1x10x1xf32> to vector<10x1xf32>
    %cst_18 = arith.constant dense<0.000000e+00> : vector<10x128xf32>
    %21 = tpu.matmul %18, %16, %cst_18 {dimension_numbers = #tpu.dot_dimension_numbers<[1], [0], [0], [1], [0, 0, 1, 1], [], []>} : vector<10x10xf32>, vector<10x128xf32>, vector<10x128xf32> -> vector<10x128xf32>
    %22 = vector.broadcast %20 : vector<10x1xf32> to vector<10x128xf32>
    %23 = arith.addf %21, %22 : vector<10x128xf32>
    %24 = math.tanh %23 : vector<10x128xf32>
    %c3 = arith.constant 3 : index
    %c0_19 = arith.constant 0 : index
    %c0_20 = arith.constant 0 : index
    %25 = vector.load %arg2[%c3, %c0_19, %c0_20] : memref<8x10x10xf32, #tpu.memory_space<vmem>>, vector<1x10x10xf32>
    %26 = vector.shape_cast %25 : vector<1x10x10xf32> to vector<10x10xf32>
    %c3_21 = arith.constant 3 : index
    %c0_22 = arith.constant 0 : index
    %c0_23 = arith.constant 0 : index
    %27 = vector.load %arg3[%c3_21, %c0_22, %c0_23] : memref<8x10x1xf32, #tpu.memory_space<vmem>>, vector<1x10x1xf32>
    %28 = vector.shape_cast %27 : vector<1x10x1xf32> to vector<10x1xf32>
    %cst_24 = arith.constant dense<0.000000e+00> : vector<10x128xf32>
    %29 = tpu.matmul %26, %24, %cst_24 {dimension_numbers = #tpu.dot_dimension_numbers<[1], [0], [0], [1], [0, 0, 1, 1], [], []>} : vector<10x10xf32>, vector<10x128xf32>, vector<10x128xf32> -> vector<10x128xf32>
    %30 = vector.broadcast %28 : vector<10x1xf32> to vector<10x128xf32>
    %31 = arith.addf %29, %30 : vector<10x128xf32>
    %32 = math.tanh %31 : vector<10x128xf32>
    %c4 = arith.constant 4 : index
    %c0_25 = arith.constant 0 : index
    %c0_26 = arith.constant 0 : index
    %33 = vector.load %arg2[%c4, %c0_25, %c0_26] : memref<8x10x10xf32, #tpu.memory_space<vmem>>, vector<1x10x10xf32>
    %34 = vector.shape_cast %33 : vector<1x10x10xf32> to vector<10x10xf32>
    %c4_27 = arith.constant 4 : index
    %c0_28 = arith.constant 0 : index
    %c0_29 = arith.constant 0 : index
    %35 = vector.load %arg3[%c4_27, %c0_28, %c0_29] : memref<8x10x1xf32, #tpu.memory_space<vmem>>, vector<1x10x1xf32>
    %36 = vector.shape_cast %35 : vector<1x10x1xf32> to vector<10x1xf32>
    %cst_30 = arith.constant dense<0.000000e+00> : vector<10x128xf32>
    %37 = tpu.matmul %34, %32, %cst_30 {dimension_numbers = #tpu.dot_dimension_numbers<[1], [0], [0], [1], [0, 0, 1, 1], [], []>} : vector<10x10xf32>, vector<10x128xf32>, vector<10x128xf32> -> vector<10x128xf32>
    %38 = vector.broadcast %36 : vector<10x1xf32> to vector<10x128xf32>
    %39 = arith.addf %37, %38 : vector<10x128xf32>
    %40 = math.tanh %39 : vector<10x128xf32>
    %c5 = arith.constant 5 : index
    %c0_31 = arith.constant 0 : index
    %c0_32 = arith.constant 0 : index
    %41 = vector.load %arg2[%c5, %c0_31, %c0_32] : memref<8x10x10xf32, #tpu.memory_space<vmem>>, vector<1x10x10xf32>
    %42 = vector.shape_cast %41 : vector<1x10x10xf32> to vector<10x10xf32>
    %c5_33 = arith.constant 5 : index
    %c0_34 = arith.constant 0 : index
    %c0_35 = arith.constant 0 : index
    %43 = vector.load %arg3[%c5_33, %c0_34, %c0_35] : memref<8x10x1xf32, #tpu.memory_space<vmem>>, vector<1x10x1xf32>
    %44 = vector.shape_cast %43 : vector<1x10x1xf32> to vector<10x1xf32>
    %cst_36 = arith.constant dense<0.000000e+00> : vector<10x128xf32>
    %45 = tpu.matmul %42, %40, %cst_36 {dimension_numbers = #tpu.dot_dimension_numbers<[1], [0], [0], [1], [0, 0, 1, 1], [], []>} : vector<10x10xf32>, vector<10x128xf32>, vector<10x128xf32> -> vector<10x128xf32>
    %46 = vector.broadcast %44 : vector<10x1xf32> to vector<10x128xf32>
    %47 = arith.addf %45, %46 : vector<10x128xf32>
    %48 = math.tanh %47 : vector<10x128xf32>
    %c6 = arith.constant 6 : index
    %c0_37 = arith.constant 0 : index
    %c0_38 = arith.constant 0 : index
    %49 = vector.load %arg2[%c6, %c0_37, %c0_38] : memref<8x10x10xf32, #tpu.memory_space<vmem>>, vector<1x10x10xf32>
    %50 = vector.shape_cast %49 : vector<1x10x10xf32> to vector<10x10xf32>
    %c6_39 = arith.constant 6 : index
    %c0_40 = arith.constant 0 : index
    %c0_41 = arith.constant 0 : index
    %51 = vector.load %arg3[%c6_39, %c0_40, %c0_41] : memref<8x10x1xf32, #tpu.memory_space<vmem>>, vector<1x10x1xf32>
    %52 = vector.shape_cast %51 : vector<1x10x1xf32> to vector<10x1xf32>
    %cst_42 = arith.constant dense<0.000000e+00> : vector<10x128xf32>
    %53 = tpu.matmul %50, %48, %cst_42 {dimension_numbers = #tpu.dot_dimension_numbers<[1], [0], [0], [1], [0, 0, 1, 1], [], []>} : vector<10x10xf32>, vector<10x128xf32>, vector<10x128xf32> -> vector<10x128xf32>
    %54 = vector.broadcast %52 : vector<10x1xf32> to vector<10x128xf32>
    %55 = arith.addf %53, %54 : vector<10x128xf32>
    %56 = math.tanh %55 : vector<10x128xf32>
    %c7 = arith.constant 7 : index
    %c0_43 = arith.constant 0 : index
    %c0_44 = arith.constant 0 : index
    %57 = vector.load %arg2[%c7, %c0_43, %c0_44] : memref<8x10x10xf32, #tpu.memory_space<vmem>>, vector<1x10x10xf32>
    %58 = vector.shape_cast %57 : vector<1x10x10xf32> to vector<10x10xf32>
    %c7_45 = arith.constant 7 : index
    %c0_46 = arith.constant 0 : index
    %c0_47 = arith.constant 0 : index
    %59 = vector.load %arg3[%c7_45, %c0_46, %c0_47] : memref<8x10x1xf32, #tpu.memory_space<vmem>>, vector<1x10x1xf32>
    %60 = vector.shape_cast %59 : vector<1x10x1xf32> to vector<10x1xf32>
    %cst_48 = arith.constant dense<0.000000e+00> : vector<10x128xf32>
    %61 = tpu.matmul %58, %56, %cst_48 {dimension_numbers = #tpu.dot_dimension_numbers<[1], [0], [0], [1], [0, 0, 1, 1], [], []>} : vector<10x10xf32>, vector<10x128xf32>, vector<10x128xf32> -> vector<10x128xf32>
    %62 = vector.broadcast %60 : vector<10x1xf32> to vector<10x128xf32>
    %63 = arith.addf %61, %62 : vector<10x128xf32>
    %64 = math.tanh %63 : vector<10x128xf32>
    %c0_49 = arith.constant 0 : index
    %c0_50 = arith.constant 0 : index
    %65 = vector.load %arg4[%c0_49, %c0_50] : memref<2x10xf32, #tpu.memory_space<vmem>>, vector<2x10xf32>
    %cst_51 = arith.constant dense<0.000000e+00> : vector<2x128xf32>
    %66 = tpu.matmul %65, %64, %cst_51 {dimension_numbers = #tpu.dot_dimension_numbers<[1], [0], [0], [1], [0, 0, 1, 1], [], []>} : vector<2x10xf32>, vector<10x128xf32>, vector<2x128xf32> -> vector<2x128xf32>
    %c0_52 = arith.constant 0 : index
    %c0_53 = arith.constant 0 : index
    %67 = vector.load %arg5[%c0_52, %c0_53] : memref<2x1xf32, #tpu.memory_space<vmem>>, vector<2x1xf32>
    %68 = vector.broadcast %67 : vector<2x1xf32> to vector<2x128xf32>
    %69 = arith.addf %66, %68 : vector<2x128xf32>
    %c0_54 = arith.constant 0 : index
    %c0_55 = arith.constant 0 : index
    %70 = vector.load %arg6[%c0_54, %c0_55] : memref<2x128xf32, #tpu.memory_space<vmem>>, vector<2x128xf32>
    tpu.vector_store %arg6[%c0_54, %c0_55], %69 {strides = array<i32>} : memref<2x128xf32, #tpu.memory_space<vmem>>, vector<2x128xf32>,
    return
  }
  func.func @transform_0(%arg0: i32) -> (i32, i32) {
    %c0_i32 = arith.constant 0 : i32
    %c0_i32_0 = arith.constant 0 : i32
    return %c0_i32, %arg0 : i32, i32
  }
  func.func @transform_1(%arg0: i32) -> (i32, i32, i32) {
    %c0_i32 = arith.constant 0 : i32
    %c0_i32_0 = arith.constant 0 : i32
    %c0_i32_1 = arith.constant 0 : i32
    %c0_i32_2 = arith.constant 0 : i32
    return %c0_i32, %c0_i32_0, %c0_i32_1 : i32, i32, i32
  }
  func.func @transform_2(%arg0: i32) -> (i32, i32, i32) {
    %c0_i32 = arith.constant 0 : i32
    %c0_i32_0 = arith.constant 0 : i32
    %c0_i32_1 = arith.constant 0 : i32
    %c0_i32_2 = arith.constant 0 : i32
    return %c0_i32, %c0_i32_0, %c0_i32_1 : i32, i32, i32
  }
  func.func @transform_3(%arg0: i32) -> (i32, i32) {
    %c0_i32 = arith.constant 0 : i32
    %c0_i32_0 = arith.constant 0 : i32
    %c0_i32_1 = arith.constant 0 : i32
    return %c0_i32, %c0_i32_0 : i32, i32
  }
  func.func @transform_4(%arg0: i32) -> (i32, i32) {
    %c0_i32 = arith.constant 0 : i32
    %c0_i32_0 = arith.constant 0 : i32
    %c0_i32_1 = arith.constant 0 : i32
    return %c0_i32, %c0_i32_0 : i32, i32
  }
  func.func @transform_5(%arg0: i32) -> (i32, i32) {
    %c0_i32 = arith.constant 0 : i32
    %c0_i32_0 = arith.constant 0 : i32
    return %c0_i32, %arg0 : i32, i32
  }
}

</mosaic_0001>

<bundles_post_ra>
// kernel: tpu_custom_call.1
= control target key start
LH: loop header
LB: loop body
LE: loop exit
PB: predicated region body
PF: predicated region fallthrough
CT: control target
= control target key end

     0   :  { %vm44_vm0 = vcmask 1041408   ;;  %vm1205_vm1 = vmmov 1   ;;  %vm37_vm3 = vcmask 80896   ;;  %v1206_v6 = vmov 0   ;;  %s1416_s0 = inlined_call_operand.vmem [shape: f32[10,128], index: 0, kind: input, shape index: {}]   ;;  %s1417_s1 = inlined_call_operand.vmem [shape: f32[8,10,10], index: 1, kind: input, shape index: {}]   ;;  %s1418_s2 = inlined_call_operand.vmem [shape: f32[8,10,1], index: 2, kind: input, shape index: {}]   ;;  %s1419_s3 = inlined_call_operand.vmem [shape: f32[2,10], index: 3, kind: input, shape index: {}]   ;;  %s1420_s4 = inlined_call_operand.vmem [shape: f32[2,1], index: 4, kind: input, shape index: {}]   ;;  %s1421_s5 = inlined_call_operand.hbm [shape: f32[2,128], index: 5, kind: output, shape index: {}]  }
   0x1   :  { %v21_v0 = vld [vmem:[%s1416_s0] sm:$0xff]  ;;  %v22_v1 = vld [vmem:[%s1416_s0 + $0x8] sm:$0x3]  ;;  %vm1250_vm2 = vmpackc.low %vm44_vm0, %vm1205_vm1  ;;  %1147 = vset.pattern.permute.xlu0 %v1206_v6  ;;  %1148 = vset.pattern.permute.xlu1 %v1206_v6 }
   0x2   :  { %v23_v2 = vld [vmem:[%s1417_s1] sm:$0xff]  ;;  %v1089_v3 = vpack.c.bf16 %v22_v1, %v21_v0  ;;  %v24_v7 = vld [vmem:[%s1417_s1 + $0x8] sm:$0x3] }
   0x3   :  { %v25_v5 = vld [vmem:[%s1418_s2] sm:$0xff]  ;;  %1030 = vmatprep.mubr.msk.f32.mxu0 %vm37_vm3, %v23_v2  ;;  %v26_v8 = vld [vmem:[%s1418_s2 + $0x8] sm:$0x3] }
   0x4   :  { %1091 = vmatprep.subr.msk.bf16.mxu0 %vm1250_vm2, %v1089_v3  ;;  %29 = vperm.xlu0 %1147, %v25_v5  }
   0x5   :  { %1094 = vmatpush3.bf16.msk.msra.mxu0 %vm1250_vm2, %v1089_v3 }
   0x6   :  { %10 = vsyncpa [#allocation3], 0  ;;  %v949_v9 = vld [vmem:[%s1418_s2 + $0x20] sm:$0xff]  ;;  %v956_v10 = vld [vmem:[%s1418_s2 + $0x30] sm:$0xff]  ;;  %vm1208_vm4 = vmmov 0   ;;  %s1210_s8 = smov [#allocation2]  }
   0x7   :  { %v963_v11 = vld [vmem:[%s1418_s2 + $0x40] sm:$0xff]  ;;  %v970_v12 = vld [vmem:[%s1418_s2 + $0x50] sm:$0xff]  ;;  %v943_v18 = vld [vmem:[%s1418_s2 + $0x18] sm:$0x3]  ;;  %s929_s9 = sshll.u32 %s1210_s8, 4  ;;  %s930_s9 = int_to_ptr.vmem [resolvable:$true] %s929_s9 }
   0x8   :  { %1031 = vmatmul.mubr.msk.f32.vlgmr.msra.gmra.mrb[0].mxu0 %vm37_vm3, %v24_v7  ;;  %34 = vperm.xlu0 %1147, %v26_v8   ;;  %v977_v13 = vld [vmem:[%s1418_s2 + $0x60] sm:$0xff]  ;;  %v984_v14 = vld [vmem:[%s1418_s2 + $0x70] sm:$0xff]  ;;  %v950_v19 = vld [vmem:[%s1418_s2 + $0x28] sm:$0x3]  ;;  %p1186_p1 = scmp.lt.s32.totalorder %s930_s9, %s930_s9 }
   0x9   :  { %v840_v15 = vld [vmem:[%s1420_s4] sm:$0x3]  ;;  %v940_v16 = vld [vmem:[%s1417_s1 + $0x10] sm:$0xff]  ;;  %v957_v20 = vld [vmem:[%s1418_s2 + $0x38] sm:$0x3] }
   0xa   :  { %1037 = vmatprep.mubr.msk.f32.mxu1 %vm37_vm3, %v940_v16  ;;  %v942_v17 = vld [vmem:[%s1418_s2 + $0x10] sm:$0xff]  ;;  %v964_v21 = vld [vmem:[%s1418_s2 + $0x48] sm:$0x3]  ;;  %v971_v22 = vld [vmem:[%s1418_s2 + $0x58] sm:$0x3] }
   0xb   :  { %133 = vperm.xlu1 %1148, %v942_v17   ;;  %v978_v23 = vld [vmem:[%s1418_s2 + $0x68] sm:$0x3]  ;;  %v985_v24 = vld [vmem:[%s1418_s2 + $0x78] sm:$0x3]  ;;  %v947_v35 = vld [vmem:[%s1417_s1 + $0x20] sm:$0xff]  ;;  %s1181_s2 = scalar_lea.vmem %s930_s9, 32 }
   0xc   :  { %235 = vperm.xlu0 %1147, %v949_v9   ;;  %v941_v34 = vld [vmem:[%s1417_s1 + $0x18] sm:$0x3]  ;;  %1044 = vmatprep.mubr.msk.f32.mxu0 %vm37_vm3, %v947_v35  ;;  %v948_v45 = vld [vmem:[%s1417_s1 + $0x28] sm:$0x3]  ;;  %v954_v46 = vld [vmem:[%s1417_s1 + $0x30] sm:$0xff]  ;;  %p1182_p0 = scmp.ne.s32.totalorder %s930_s9, %s1181_s2  ;;  %p1187_p2 = scmp.lt.s32.totalorder %s1181_s2, %s1181_s2 }
   0xd   :  { %v955_v56 = vld [vmem:[%s1417_s1 + $0x38] sm:$0x3]  ;;  %v961_v57 = vld [vmem:[%s1417_s1 + $0x40] sm:$0xff]  ;;  %v962_v3 = vld [vmem:[%s1417_s1 + $0x48] sm:$0x3] }
   0xe   :  { %v968_v5 = vld [vmem:[%s1417_s1 + $0x50] sm:$0xff]  ;;  %v975_v16 = vld [vmem:[%s1417_s1 + $0x60] sm:$0xff]  ;;  %p1188_p3 = por %p1187_p2, %p1186_p1 }
   0xf   :  { %138 = vperm.xlu1 %1148, %v943_v18  }
  0x10   :  { %337 = vperm.xlu0 %1147, %v956_v10   ;;  %p1189_p4 = pnand %p1188_p3, %p1182_p0 }
  0x13   :  { %240 = vperm.xlu1 %1148, %v950_v19  }
  0x14   :  { %439 = vperm.xlu0 %1147, %v963_v11  }
  0x17   :  { %342 = vperm.xlu1 %1148, %v957_v20  }
  0x18   :  { %541 = vperm.xlu0 %1147, %v970_v12  }
  0x1b   :  { %444 = vperm.xlu1 %1148, %v964_v21  }
  0x1c   :  { %643 = vperm.xlu0 %1147, %v977_v13  }
  0x1f   :  { %546 = vperm.xlu1 %1148, %v971_v22  }
  0x20   :  { %745 = vperm.xlu0 %1147, %v984_v14  }
  0x23   :  { %648 = vperm.xlu1 %1148, %v978_v23  }
  0x24   :  { %843 = vperm.xlu0 %1147, %v840_v15   ;;  %v969_v15 = vld [vmem:[%s1417_s1 + $0x58] sm:$0x3] }
  0x27   :  { %750 = vperm.xlu1 %1148, %v985_v24  }
  0x83   :  { %v30_v25 = vpop.permute.xlu0 %29 }
  0x87   :  { %v35_v26 = vpop.permute.xlu0 %34 }
  0x8a   :  { %v134_v36 = vpop.permute.xlu1 %133 }
  0x8b   :  { %v236_v49 = vpop.permute.xlu0 %235 }
  0x8e   :  { %v139_v37 = vpop.permute.xlu1 %138 }
  0x8f   :  { %v338_v60 = vpop.permute.xlu0 %337 }
  0x92   :  { %v241_v47 = vpop.permute.xlu1 %240 }
  0x93   :  { %v440_v8 = vpop.permute.xlu0 %439 }
  0x96   :  { %v343_v58 = vpop.permute.xlu1 %342 }
  0x97   :  { %v542_v19 = vpop.permute.xlu0 %541 }
  0x9a   :  { %v445_v6 = vpop.permute.xlu1 %444 }
  0x9e   :  { %v547_v17 = vpop.permute.xlu1 %546 }
  0xdb   :  { %v1032_v27 = vpop.f32.mrb[0].mxu0 }
  0xdc   :  { %v120_v28 = vadd.f32 %v1032_v27, %v35_v26  ;;  %v114_v29 = vpop.f32.mrb[1].mxu0  ;;  %v976_v26 = vld [vmem:[%s1417_s1 + $0x68] sm:$0x3]  ;;  %v982_v27 = vld [vmem:[%s1417_s1 + $0x70] sm:$0xff] }
  0xdd   :  { %v115_v30 = vadd.f32 %v114_v29, %v30_v25 }
  0xde   :  { %1149 = vtanh.f32 %v120_v28  ;;  %v649_v28 = vpop.permute.xlu1 %648 }
  0xdf   :  { %1151 = vtanh.f32 %v115_v30  ;;  %v644_v30 = vpop.permute.xlu0 %643 }
  0xe8   :  { %v1150_v31 = vpop.eup %1149 }
  0xe9   :  { %v1152_v32 = vpop.eup %1151 }
  0xea   :  { %v1095_v33 = vpack.c.bf16 %v1150_v31, %v1152_v32 }
  0xec   :  { %1097 = vmatprep.subr.msk.bf16.mxu1 %vm1250_vm2, %v1095_v33 }
  0xed   :  { %1100 = vmatpush3.bf16.msk.msra.mxu1 %vm1250_vm2, %v1095_v33 }
  0xf0   :  { %1038 = vmatmul.mubr.msk.f32.vlgmr.msra.gmra.mrb[0].mxu1 %vm37_vm3, %v941_v34 }
  0xf1   :  { %1051 = vmatprep.mubr.msk.f32.mxu1 %vm37_vm3, %v954_v46 }
 0x1c3   :  { %v1039_v38 = vpop.f32.mrb[0].mxu1 }
 0x1c4   :  { %v222_v39 = vadd.f32 %v1039_v38, %v139_v37  ;;  %v216_v40 = vpop.f32.mrb[1].mxu1  ;;  %v983_v37 = vld [vmem:[%s1417_s1 + $0x78] sm:$0x3]  ;;  %v1207_v38 = vmov 0.0|0.0  }
 0x1c5   :  { %v217_v41 = vadd.f32 %v216_v40, %v134_v36  ;;  %v751_v40 = vpop.permute.xlu1 %750 }
 0x1c6   :  { %1153 = vtanh.f32 %v222_v39  ;;  %v1209_v39 = vmov 0.0  }
 0x1c7   :  { %1155 = vtanh.f32 %v217_v41 }
 0x1d0   :  { %v1154_v42 = vpop.eup %1153 }
 0x1d1   :  { %v1156_v43 = vpop.eup %1155 }
 0x1d2   :  { %v1101_v44 = vpack.c.bf16 %v1154_v42, %v1156_v43  ;;  %v746_v42 = vpop.permute.xlu0 %745 }
 0x1d4   :  { %1103 = vmatprep.subr.msk.bf16.mxu0 %vm1250_vm2, %v1101_v44 }
 0x1d5   :  { %1106 = vmatpush3.bf16.msk.msra.mxu0 %vm1250_vm2, %v1101_v44 }
 0x1d8   :  { %1045 = vmatmul.mubr.msk.f32.vlgmr.msra.gmra.mrb[2].mxu0 %vm37_vm3, %v948_v45 }
 0x1d9   :  { %1058 = vmatprep.mubr.msk.f32.mxu0 %vm37_vm3, %v961_v57 }
 0x2ab   :  { %v1046_v48 = vpop.f32.mrb[2].mxu0 }
 0x2ac   :  { %v324_v50 = vadd.f32 %v1046_v48, %v241_v47  ;;  %v318_v51 = vpop.f32.mrb[3].mxu0 }
 0x2ad   :  { %v319_v52 = vadd.f32 %v318_v51, %v236_v49  ;;  %v839_v49 = vld [vmem:[%s1419_s3] sm:$0x3] }
 0x2ae   :  { %1157 = vtanh.f32 %v324_v50  ;;  %v844_v50 = vpop.permute.xlu0 %843 }
 0x2af   :  { %1159 = vtanh.f32 %v319_v52 }
 0x2b8   :  { %v1158_v53 = vpop.eup %1157 }
 0x2b9   :  { %v1160_v54 = vpop.eup %1159 }
 0x2ba   :  { %v1107_v55 = vpack.c.bf16 %v1158_v53, %v1160_v54 }
 0x2bc   :  { %1109 = vmatprep.subr.msk.bf16.mxu1 %vm1250_vm2, %v1107_v55 }
 0x2bd   :  { %1112 = vmatpush3.bf16.msk.msra.mxu1 %vm1250_vm2, %v1107_v55 }
 0x2c0   :  { %1052 = vmatmul.mubr.msk.f32.vlgmr.msra.gmra.mrb[2].mxu1 %vm37_vm3, %v955_v56 }
 0x2c1   :  { %1065 = vmatprep.mubr.msk.f32.mxu1 %vm37_vm3, %v968_v5 }
 0x393   :  { %v1053_v59 = vpop.f32.mrb[2].mxu1 }
 0x394   :  { %v426_v61 = vadd.f32 %v1053_v59, %v343_v58  ;;  %v420_v62 = vpop.f32.mrb[3].mxu1 }
 0x395   :  { %v421_v63 = vadd.f32 %v420_v62, %v338_v60 }
 0x396   :  { %1161 = vtanh.f32 %v426_v61 }
 0x397   :  { %1163 = vtanh.f32 %v421_v63 }
 0x3a0   :  { %v1162_v0 = vpop.eup %1161 }
 0x3a1   :  { %v1164_v1 = vpop.eup %1163 }
 0x3a2   :  { %v1113_v2 = vpack.c.bf16 %v1162_v0, %v1164_v1 }
 0x3a4   :  { %1115 = vmatprep.subr.msk.bf16.mxu0 %vm1250_vm2, %v1113_v2 }
 0x3a5   :  { %1118 = vmatpush3.bf16.msk.msra.mxu0 %vm1250_vm2, %v1113_v2 }
 0x3a8   :  { %1059 = vmatmul.mubr.msk.f32.vlgmr.msra.gmra.mrb[4].mxu0 %vm37_vm3, %v962_v3 }
 0x3a9   :  { %1072 = vmatprep.mubr.msk.f32.mxu0 %vm37_vm3, %v975_v16 }
 0x47b   :  { %v1060_v7 = vpop.f32.mrb[4].mxu0 }
 0x47c   :  { %v528_v9 = vadd.f32 %v1060_v7, %v445_v6  ;;  %v522_v10 = vpop.f32.mrb[5].mxu0 }
 0x47d   :  { %v523_v11 = vadd.f32 %v522_v10, %v440_v8 }
 0x47e   :  { %1165 = vtanh.f32 %v528_v9 }
 0x47f   :  { %1167 = vtanh.f32 %v523_v11 }
 0x488   :  { %v1166_v12 = vpop.eup %1165 }
 0x489   :  { %v1168_v13 = vpop.eup %1167 }
 0x48a   :  { %v1119_v14 = vpack.c.bf16 %v1166_v12, %v1168_v13 }
 0x48c   :  { %1121 = vmatprep.subr.msk.bf16.mxu1 %vm1250_vm2, %v1119_v14 }
 0x48d   :  { %1124 = vmatpush3.bf16.msk.msra.mxu1 %vm1250_vm2, %v1119_v14 }
 0x490   :  { %1066 = vmatmul.mubr.msk.f32.vlgmr.msra.gmra.mrb[4].mxu1 %vm37_vm3, %v969_v15 }
 0x491   :  { %1079 = vmatprep.mubr.msk.f32.mxu1 %vm37_vm3, %v982_v27 }
 0x563   :  { %v1067_v18 = vpop.f32.mrb[4].mxu1 }
 0x564   :  { %v630_v20 = vadd.f32 %v1067_v18, %v547_v17  ;;  %v624_v21 = vpop.f32.mrb[5].mxu1 }
 0x565   :  { %v625_v22 = vadd.f32 %v624_v21, %v542_v19 }
 0x566   :  { %1169 = vtanh.f32 %v630_v20 }
 0x567   :  { %1171 = vtanh.f32 %v625_v22 }
 0x570   :  { %v1170_v23 = vpop.eup %1169 }
 0x571   :  { %v1172_v24 = vpop.eup %1171 }
 0x572   :  { %v1125_v25 = vpack.c.bf16 %v1170_v23, %v1172_v24 }
 0x574   :  { %1127 = vmatprep.subr.msk.bf16.mxu0 %vm1250_vm2, %v1125_v25 }
 0x575   :  { %1130 = vmatpush3.bf16.msk.msra.mxu0 %vm1250_vm2, %v1125_v25 }
 0x576   :  { %1137 = vmatprep.subr.bf16.mxu0 %v1207_v38 }
 0x578   :  { %1073 = vmatmul.mubr.msk.f32.vlgmr.msra.gmra.mrb[6].mxu0 %vm37_vm3, %v976_v26 }
 0x579   :  { %1086 = vmatprep.mubr.msk.f32.mxu0 %vm1208_vm4, %v1209_v39 }
 0x64b   :  { %v1074_v29 = vpop.f32.mrb[6].mxu0 }
 0x64c   :  { %v732_v31 = vadd.f32 %v1074_v29, %v649_v28  ;;  %v726_v32 = vpop.f32.mrb[7].mxu0 }
 0x64d   :  { %v727_v33 = vadd.f32 %v726_v32, %v644_v30 }
 0x64e   :  { %1173 = vtanh.f32 %v732_v31 }
 0x64f   :  { %1175 = vtanh.f32 %v727_v33 }
 0x658   :  { %v1174_v34 = vpop.eup %1173 }
 0x659   :  { %v1176_v35 = vpop.eup %1175 }
 0x65a   :  { %v1131_v36 = vpack.c.bf16 %v1174_v34, %v1176_v35 }
 0x65c   :  { %1133 = vmatprep.subr.msk.bf16.mxu1 %vm1250_vm2, %v1131_v36 }
 0x65d   :  { %1136 = vmatpush3.bf16.msk.msra.mxu1 %vm1250_vm2, %v1131_v36 }
 0x660   :  { %1080 = vmatmul.mubr.msk.f32.vlgmr.msra.gmra.mrb[6].mxu1 %vm37_vm3, %v983_v37 }
 0x733   :  { %v1081_v41 = vpop.f32.mrb[6].mxu1 }
 0x734   :  { %v834_v43 = vadd.f32 %v1081_v41, %v751_v40  ;;  %v828_v44 = vpop.f32.mrb[7].mxu1 }
 0x735   :  { %v829_v45 = vadd.f32 %v828_v44, %v746_v42 }
 0x736   :  { %1177 = vtanh.f32 %v834_v43 }
 0x737   :  { %1179 = vtanh.f32 %v829_v45 }
 0x740   :  { %v1178_v46 = vpop.eup %1177 }
 0x741   :  { %v1180_v47 = vpop.eup %1179 }
 0x742   :  { %v1138_v48 = vpack.c.bf16 %v1178_v46, %v1180_v47 }
 0x744   :  { %1140 = vmatpush3.bf16.msk.msra.mxu0 %vm1250_vm2, %v1138_v48 }
 0x747   :  { %1087 = vmatmul.mubr.msk.f32.vlgmr.msra.gmra.mrb[8].mxu0 %vm37_vm3, %v839_v49 }
 0x81a   :  { %v918_v51 = vpop.f32.mrb[8].mxu0 }
 0x81b   :  { %v919_v52 = vadd.f32 %v918_v51, %v844_v50  ;;  %v1088_v53 = vpop.f32.mrb[9].mxu0 }
 0x81d   :  { %922 = vst [vmem:[#allocation2] sm:$0x3] %v919_v52 }
 0x81e   :  { %1192 = shalt.err (!%p1189_p4)
}
 0x81f   :  { %s1193_s3 = scalar_lea.hbm %s1421_s5, 32 }
 0x820   :  { %p1194_p5 = scmp.ne.s32.totalorder %s1421_s5, %s1193_s3  ;;  %p1197_p6 = scmp.lt.u32.totalorder %s1193_s3, %s1421_s5 }
 0x822   :  { %p1199_p7 = pnand %p1197_p6, %p1194_p5 }
 0x824   :  { %1202 = shalt.err (!%p1199_p7)
}
 0x825   :  { %932 = dma.vmem_to_hbm [thread:$0]  %s930_s9, 32, %s1421_s5, [#allocation3]  }
 0x826   :  { %1203 = dma.done.wait [#allocation3], 32  }
 0x827   :  { %1204 = vsyncadd [#allocation3], 4294967264 }
 0x828   :  { %936 = vsyncpa [#allocation3], 1 }

</bundles_post_ra>
